<compile_context>
chip_gen: v5e
topology: v5e:2x2
jax: 0.10.0
libtpu: 0.0.40
codegen_flags: <defaults>
</compile_context>

<pallas_src>
import jax
import jax.numpy as jnp
from jax.experimental import pallas as pl
from jax.experimental.pallas import tpu as pltpu


def _round_up(x, m):
    return (x + m - 1) // m * m


def _generator_kernel(x_ref, w1_ref, b1_ref, w2_ref, b2_ref, o_ref):
    # hidden = LeakyReLU(x @ W1 + b1, 0.2)   -- bf16 operands, f32 accumulate
    h = jnp.dot(x_ref[...], w1_ref[...], preferred_element_type=jnp.float32)
    h = h + b1_ref[...]                      # (tb, Hp) + (1, Hp), f32
    h = jnp.where(h > 0, h, 0.2 * h)         # LeakyReLU(0.2), f32 VPU
    # dropout (inference) == identity
    # out = hidden @ W2 + b2
    out = jnp.dot(h.astype(w2_ref.dtype), w2_ref[...],
                  preferred_element_type=jnp.float32)
    out = out + b2_ref[...]                  # (tb, Op) + (1, Op), f32
    o_ref[...] = out.astype(o_ref.dtype)


def generator_forward(x, w1, b1, w2, b2, *, tb=None, feat_multiple=128):
    """Fused Generator forward.

    x : (B, noise_size)   float32 (cast to bf16 for the MXU)
    w1: (noise_size, H)   float32   b1: (H,)
    w2: (H, output_size)  float32   b2: (output_size,)
    returns (B, output_size) float32

    feat_multiple: lane-padding granularity (128 min; 256 preferred on
    v6e/v7x for full 2x256^2 MXU passes).
    """
    B, N = x.shape
    H = w1.shape[1]
    O = w2.shape[1]

    # Lane-dense padding of the feature dims.
    Np = _round_up(N, feat_multiple)
    Hp = _round_up(H, feat_multiple)
    Op = _round_up(O, feat_multiple)

    # Explicit batch tile: multiple of 8 sublanes, capped so VMEM stays sane;
    # large batches get >= 2 grid tiles (feeds both v7x TensorCores).
    if tb is None:
        tb = min(256, _round_up(B, 8))
    Bp = _round_up(B, tb)

    # Zero-padding keeps semantics exact:
    #   - padded x cols / W1 rows are zero -> no contribution to h
    #   - padded hidden lanes: dot=0, b1=0 -> h=0 -> LeakyReLU(0)=0, and the
    #     corresponding W2 rows are zero anyway
    #   - padded output lanes / batch rows are sliced off below.
    x_p = jnp.zeros((Bp, Np), jnp.bfloat16).at[:B, :N].set(x.astype(jnp.bfloat16))
    w1_p = jnp.zeros((Np, Hp), jnp.bfloat16).at[:N, :H].set(w1.astype(jnp.bfloat16))
    b1_p = jnp.zeros((1, Hp), jnp.float32).at[0, :H].set(b1.astype(jnp.float32))
    w2_p = jnp.zeros((Hp, Op), jnp.bfloat16).at[:H, :O].set(w2.astype(jnp.bfloat16))
    b2_p = jnp.zeros((1, Op), jnp.float32).at[0, :O].set(b2.astype(jnp.float32))

    grid = (Bp // tb,)
    out_p = pl.pallas_call(
        _generator_kernel,
        out_shape=jax.ShapeDtypeStruct((Bp, Op), jnp.float32),
        grid_spec=pltpu.PrefetchScalarGridSpec(
            num_scalar_prefetch=0,
            grid=grid,
            in_specs=[
                pl.BlockSpec((tb, Np), lambda i: (i, 0)),   # x tile (bf16)
                pl.BlockSpec((Np, Hp), lambda i: (0, 0)),   # W1 resident (bf16)
                pl.BlockSpec((1, Hp), lambda i: (0, 0)),    # b1 (f32)
                pl.BlockSpec((Hp, Op), lambda i: (0, 0)),   # W2 resident (bf16)
                pl.BlockSpec((1, Op), lambda i: (0, 0)),    # b2 (f32)
            ],
            out_specs=pl.BlockSpec((tb, Op), lambda i: (i, 0)),
        ),
        compiler_params=pltpu.CompilerParams(
            dimension_semantics=("parallel",),
        ),
    )(x_p, w1_p, b1_p, w2_p, b2_p)
    return out_p[:B, :O]


def init_generator_params(key, noise_size, hidden_size, output_size):
    """Deterministic init mimicking PyTorch nn.Linear default:
    U(-1/sqrt(fan_in), 1/sqrt(fan_in)) for both weight and bias.
    Weights returned already transposed to (in, out)."""
    k1, k2, k3, k4 = jax.random.split(key, 4)
    bound1 = 1.0 / (noise_size ** 0.5)
    w1 = jax.random.uniform(k1, (noise_size, hidden_size), jnp.float32,
                            minval=-bound1, maxval=bound1)
    b1 = jax.random.uniform(k2, (hidden_size,), jnp.float32,
                            minval=-bound1, maxval=bound1)
    bound2 = 1.0 / (hidden_size ** 0.5)
    w2 = jax.random.uniform(k3, (hidden_size, output_size), jnp.float32,
                            minval=-bound2, maxval=bound2)
    b2 = jax.random.uniform(k4, (output_size,), jnp.float32,
                            minval=-bound2, maxval=bound2)
    return w1, b1, w2, b2


def generator_reference(x, w1, b1, w2, b2):
    """Same math, same bf16 operand quantization, plain XLA (for validation)."""
    xb = x.astype(jnp.bfloat16)
    w1b = w1.astype(jnp.bfloat16)
    w2b = w2.astype(jnp.bfloat16)
    h = jnp.dot(xb, w1b, preferred_element_type=jnp.float32) + b1
    h = jnp.where(h > 0, h, 0.2 * h)
    return jnp.dot(h.astype(jnp.bfloat16), w2b,
                   preferred_element_type=jnp.float32) + b2


if __name__ == "__main__":
    # Small shapes consistent with Generator(noise_size, output_size, [hidden]):
    batch = 8
    noise_size = 32
    hidden_size = 32
    output_size = 64

    key = jax.random.PRNGKey(0)
    k_params, k_noise = jax.random.split(key)
    w1, b1, w2, b2 = init_generator_params(k_params, noise_size,
                                           hidden_size, output_size)
    noise = jax.random.normal(k_noise, (batch, noise_size), jnp.float32)

    out = generator_forward(noise, w1, b1, w2, b2)
    out = jax.block_until_ready(out)

    ref = generator_reference(noise, w1, b1, w2, b2)
    assert out.shape == (batch, output_size)
    assert jnp.allclose(out, ref, atol=1e-3, rtol=1e-3), "mismatch vs reference"

    print("KERNEL_OK")
</pallas_src>

<mosaic_0001>
module attributes {stable_mosaic.version = 11 : i64} {
  func.func @_generator_kernel(%arg0: i32, %arg1: memref<8x128xbf16, #tpu.memory_space<vmem>>, %arg2: memref<128x128xbf16, #tpu.memory_space<vmem>>, %arg3: memref<1x128xf32, #tpu.memory_space<vmem>>, %arg4: memref<128x128xbf16, #tpu.memory_space<vmem>>, %arg5: memref<1x128xf32, #tpu.memory_space<vmem>>, %arg6: memref<8x128xf32, #tpu.memory_space<vmem>>) attributes {dimension_semantics = [#tpu.dimension_semantics<parallel>], iteration_bounds = array<i64: 1>, scalar_prefetch = 0 : i64, scratch_operands = 0 : i64, tpu.core_type = #tpu.core_type<tc>, window_params = [{transform_indices = @transform_0, window_bounds = array<i64: 8, 128>}, {pipeline_mode = #tpu.pipeline_mode<synchronous>, transform_indices = @transform_1, window_bounds = array<i64: 128, 128>}, {pipeline_mode = #tpu.pipeline_mode<synchronous>, transform_indices = @transform_2, window_bounds = array<i64: 1, 128>}, {pipeline_mode = #tpu.pipeline_mode<synchronous>, transform_indices = @transform_3, window_bounds = array<i64: 128, 128>}, {pipeline_mode = #tpu.pipeline_mode<synchronous>, transform_indices = @transform_4, window_bounds = array<i64: 1, 128>}, {transform_indices = @transform_5, window_bounds = array<i64: 8, 128>}]} {
    %c0 = arith.constant 0 : index
    %c0_0 = arith.constant 0 : index
    %0 = vector.load %arg1[%c0, %c0_0] : memref<8x128xbf16, #tpu.memory_space<vmem>>, vector<8x128xbf16>
    %c0_1 = arith.constant 0 : index
    %c0_2 = arith.constant 0 : index
    %1 = vector.load %arg2[%c0_1, %c0_2] : memref<128x128xbf16, #tpu.memory_space<vmem>>, vector<128x128xbf16>
    %cst = arith.constant dense<0.000000e+00> : vector<8x128xf32>
    %2 = tpu.matmul %0, %1, %cst {dimension_numbers = #tpu.dot_dimension_numbers<[1], [0], [0], [1], [0, 0, 1, 1], [], []>} : vector<8x128xbf16>, vector<128x128xbf16>, vector<8x128xf32> -> vector<8x128xf32>
    %c0_3 = arith.constant 0 : index
    %c0_4 = arith.constant 0 : index
    %3 = vector.load %arg3[%c0_3, %c0_4] : memref<1x128xf32, #tpu.memory_space<vmem>>, vector<1x128xf32>
    %4 = vector.broadcast %3 : vector<1x128xf32> to vector<8x128xf32>
    %5 = arith.addf %2, %4 : vector<8x128xf32>
    %cst_5 = arith.constant 0.000000e+00 : f32
    %6 = vector.broadcast %cst_5 : f32 to vector<8x128xf32>
    %7 = arith.cmpf ogt, %5, %6 : vector<8x128xf32>
    %cst_6 = arith.constant 2.000000e-01 : f32
    %8 = vector.broadcast %cst_6 : f32 to vector<8x128xf32>
    %9 = arith.mulf %8, %5 : vector<8x128xf32>
    %10 = arith.select %7, %5, %9 : vector<8x128xi1>, vector<8x128xf32>
    %11 = arith.truncf %10 : vector<8x128xf32> to vector<8x128xbf16>
    %c0_7 = arith.constant 0 : index
    %c0_8 = arith.constant 0 : index
    %12 = vector.load %arg4[%c0_7, %c0_8] : memref<128x128xbf16, #tpu.memory_space<vmem>>, vector<128x128xbf16>
    %cst_9 = arith.constant dense<0.000000e+00> : vector<8x128xf32>
    %13 = tpu.matmul %11, %12, %cst_9 {dimension_numbers = #tpu.dot_dimension_numbers<[1], [0], [0], [1], [0, 0, 1, 1], [], []>} : vector<8x128xbf16>, vector<128x128xbf16>, vector<8x128xf32> -> vector<8x128xf32>
    %c0_10 = arith.constant 0 : index
    %c0_11 = arith.constant 0 : index
    %14 = vector.load %arg5[%c0_10, %c0_11] : memref<1x128xf32, #tpu.memory_space<vmem>>, vector<1x128xf32>
    %15 = vector.broadcast %14 : vector<1x128xf32> to vector<8x128xf32>
    %16 = arith.addf %13, %15 : vector<8x128xf32>
    %c0_12 = arith.constant 0 : index
    %c0_13 = arith.constant 0 : index
    %17 = vector.load %arg6[%c0_12, %c0_13] : memref<8x128xf32, #tpu.memory_space<vmem>>, vector<8x128xf32>
    tpu.vector_store %arg6[%c0_12, %c0_13], %16 {strides = array<i32>} : memref<8x128xf32, #tpu.memory_space<vmem>>, vector<8x128xf32>,
    return
  }
  func.func @transform_0(%arg0: i32) -> (i32, i32) {
    %c0_i32 = arith.constant 0 : i32
    %c0_i32_0 = arith.constant 0 : i32
    return %arg0, %c0_i32 : i32, i32
  }
  func.func @transform_1(%arg0: i32) -> (i32, i32) {
    %c0_i32 = arith.constant 0 : i32
    %c0_i32_0 = arith.constant 0 : i32
    %c0_i32_1 = arith.constant 0 : i32
    return %c0_i32, %c0_i32_0 : i32, i32
  }
  func.func @transform_2(%arg0: i32) -> (i32, i32) {
    %c0_i32 = arith.constant 0 : i32
    %c0_i32_0 = arith.constant 0 : i32
    %c0_i32_1 = arith.constant 0 : i32
    return %c0_i32, %c0_i32_0 : i32, i32
  }
  func.func @transform_3(%arg0: i32) -> (i32, i32) {
    %c0_i32 = arith.constant 0 : i32
    %c0_i32_0 = arith.constant 0 : i32
    %c0_i32_1 = arith.constant 0 : i32
    return %c0_i32, %c0_i32_0 : i32, i32
  }
  func.func @transform_4(%arg0: i32) -> (i32, i32) {
    %c0_i32 = arith.constant 0 : i32
    %c0_i32_0 = arith.constant 0 : i32
    %c0_i32_1 = arith.constant 0 : i32
    return %c0_i32, %c0_i32_0 : i32, i32
  }
  func.func @transform_5(%arg0: i32) -> (i32, i32) {
    %c0_i32 = arith.constant 0 : i32
    %c0_i32_0 = arith.constant 0 : i32
    return %arg0, %c0_i32 : i32, i32
  }
}

</mosaic_0001>

<bundles_post_ra>
// kernel: tpu_custom_call.1
= control target key start
LH: loop header
LB: loop body
LE: loop exit
PB: predicated region body
PF: predicated region fallthrough
CT: control target
= control target key end

     0   :  { %10 = vsyncpa [#allocation3], 0  ;;  %s496_s0 = inlined_call_operand.hbm [shape: bf16[8,128], index: 0, kind: input, shape index: {}]   ;;  %s497_s1 = inlined_call_operand.hbm [shape: bf16[128,128], index: 1, kind: input, shape index: {}]   ;;  %s498_s2 = inlined_call_operand.vmem [shape: f32[1,128], index: 2, kind: input, shape index: {}]   ;;  %s499_s3 = inlined_call_operand.hbm [shape: bf16[128,128], index: 3, kind: input, shape index: {}]   ;;  %s500_s4 = inlined_call_operand.vmem [shape: f32[1,128], index: 4, kind: input, shape index: {}]   ;;  %s501_s5 = inlined_call_operand.hbm [shape: f32[8,128], index: 5, kind: output, shape index: {}]  }
   0x1   :  { %11 = vsyncpa [#allocation6], 0  ;;  %s28_s20 = sshll.u32 %s497_s1, 4  ;;  %s29_s20 = int_to_ptr.hbm [resolvable:$true] %s28_s20 }
   0x2   :  { %12 = vsyncpa [#allocation4], 0  ;;  %s442_s21 = smov [#allocation5]   ;;  %s18_s25 = sshll.u32 %s496_s0, 4  ;;  %s19_s25 = int_to_ptr.hbm [resolvable:$true] %s18_s25 }
   0x3   :  { %s30_s22 = sshll.u32 %s442_s21, 4  ;;  %s443_s26 = smov 64   ;;  %s31_s22 = int_to_ptr.vmem [resolvable:$true] %s30_s22 }
   0x4   :  { %s444_s27 = smov 4   ;;  %s445_s28 = smov [#allocation2]  }
   0x5   :  { %36 = dma.hbm_to_vmem [thread:$0]  %s29_s20, 1024, %s31_s22, [#allocation6], %s443_s26, %s443_s26, %s444_s27  }
   0x6   :  { %s20_s29 = sshll.u32 %s445_s28, 4  ;;  %s43_s7 = sshll.u32 %s499_s3, 4  ;;  %s21_s29 = int_to_ptr.vmem [resolvable:$true] %s20_s29  ;;  %s44_s7 = int_to_ptr.hbm [resolvable:$true] %s43_s7 }
   0x7   :  { %23 = dma.hbm_to_vmem [thread:$0]  %s19_s25, 64, %s21_s29, [#allocation3]  }
   0x8   :  { %s446_s1 = smov [#allocation7]  }
   0x9   :  { %s45_s8 = sshll.u32 %s446_s1, 4  ;;  %s46_s8 = int_to_ptr.vmem [resolvable:$true] %s45_s8 }
   0xa   :  { %51 = dma.hbm_to_vmem [thread:$0]  %s44_s7, 1024, %s46_s8, [#allocation6], %s443_s26, %s443_s26, %s444_s27  }
   0xb   :  { %436 = dma.done.wait [#allocation3], 64  }
   0xc   :  { %437 = vsyncadd [#allocation3], 4294967232 }
   0xd   :  { %438 = dma.done.wait [#allocation6], 2048  }
   0xe   :  { %439 = vsyncadd [#allocation6], 4294965248  ;;  %v323_v0 = vld [vmem:[#allocation5 + $0x38] sm:$0xff]  ;;  %v322_v1 = vld [vmem:[#allocation5 + $0x30] sm:$0xff]  ;;  %s447_s11 = smov [#allocation8]   ;;  %s241_s15 = sshll.u32 %s501_s5, 4  ;;  %s242_s15 = int_to_ptr.hbm [resolvable:$true] %s241_s15 }
   0xf   :  { %135 = vmatpush.bf16.msra.mxu0 %v323_v0  ;;  %v331_v2 = vld [vmem:[#allocation7 + $0x38] sm:$0xff]  ;;  %v330_v3 = vld [vmem:[#allocation7 + $0x30] sm:$0xff]  ;;  %v321_v4 = vld [vmem:[#allocation5 + $0x28] sm:$0xff]  ;;  %s239_s12 = sshll.u32 %s447_s11, 4  ;;  %s240_s12 = int_to_ptr.vmem [resolvable:$true] %s239_s12 }
  0x10   :  { %220 = vmatpush.bf16.msra.mxu1 %v331_v2  ;;  %v329_v5 = vld [vmem:[#allocation7 + $0x28] sm:$0xff]  ;;  %v320_v6 = vld [vmem:[#allocation5 + $0x20] sm:$0xff]  ;;  %v319_v8 = vld [vmem:[#allocation5 + $0x18] sm:$0xff] }
  0x11   :  { %v328_v7 = vld [vmem:[#allocation7 + $0x20] sm:$0xff]  ;;  %v327_v9 = vld [vmem:[#allocation7 + $0x18] sm:$0xff]  ;;  %v318_v10 = vld [vmem:[#allocation5 + $0x10] sm:$0xff] }
  0x12   :  { %v326_v11 = vld [vmem:[#allocation7 + $0x10] sm:$0xff]  ;;  %v317_v12 = vld [vmem:[#allocation5 + $0x8] sm:$0xff]  ;;  %v316_v13 = vld [vmem:[#allocation5] sm:$0xff] }
  0x13   :  { %136 = vmatpush.bf16.msra.mxu0 %v322_v1  ;;  %v66_v14 = vld [vmem:[#allocation2] sm:$0xf]  ;;  %v325_v15 = vld [vmem:[#allocation7 + $0x8] sm:$0xff]  ;;  %v324_v16 = vld [vmem:[#allocation7] sm:$0xff] }
  0x14   :  { %221 = vmatpush.bf16.msra.mxu1 %v330_v3  ;;  %v338_v17 = vld [vmem:[%s498_s2] ss:$0 sm:$0xff] }
  0x15   :  { %v339_v24 = vld [vmem:[%s500_s4] ss:$0 sm:$0xff] }
  0x17   :  { %137 = vmatpush.bf16.msra.mxu0 %v321_v4 }
  0x18   :  { %222 = vmatpush.bf16.msra.mxu1 %v329_v5 }
  0x1b   :  { %138 = vmatpush.bf16.msra.mxu0 %v320_v6 }
  0x1c   :  { %223 = vmatpush.bf16.msra.mxu1 %v328_v7 }
  0x1f   :  { %139 = vmatpush.bf16.msra.mxu0 %v319_v8 }
  0x20   :  { %224 = vmatpush.bf16.msra.mxu1 %v327_v9 }
  0x23   :  { %140 = vmatpush.bf16.msra.mxu0 %v318_v10 }
  0x24   :  { %225 = vmatpush.bf16.msra.mxu1 %v326_v11 }
  0x27   :  { %141 = vmatpush.bf16.msra.mxu0 %v317_v12 }
  0x28   :  { %226 = vmatpush.bf16.msra.mxu1 %v325_v15 }
  0x2b   :  { %142 = vmatpush.bf16.msra.mxu0 %v316_v13 }
  0x2c   :  { %227 = vmatpush.bf16.msra.mxu1 %v324_v16 }
  0x2e   :  { %143 = vmatmul.bf16.vlgmr.msra.gmra.mxu0 %v66_v14 }
  0xab   :  { %v144_v18 = vpop.f32.mrf.mxu0 }
  0xac   :  { %v145_v19 = vadd.f32 %v338_v17, %v144_v18 }
  0xae   :  { %v149_v20 = vmul.f32 0.2, %v145_v19  ;;  %vm148_vm0 = vcmp.gt.f32.partialorder %v145_v19, 0.0 }
  0xb0   :  { %v150_v21 = vsel %vm148_vm0, %v145_v19, %v149_v20 }
  0xb1   :  { %v151_v22 = vpack.c.bf16 %v150_v21, %v150_v21 }
  0xb3   :  { %v146_v23 = vpop.f32.mrf.mxu0  ;;  %228 = vmatmul.bf16.vlgmr.msra.gmra.mxu1 %v151_v22 }
 0x130   :  { %v229_v25 = vpop.f32.mrf.mxu1 }
 0x131   :  { %v230_v26 = vadd.f32 %v339_v24, %v229_v25 }
 0x133   :  { %233 = vst [vmem:[#allocation8] sm:$0xff] %v230_v26 }
 0x134   :  { %244 = dma.vmem_to_hbm [thread:$0]  %s240_s12, 128, %s242_s15, [#allocation4]  }
 0x138   :  { %v231_v27 = vpop.f32.mrf.mxu1 }
 0x139   :  { %440 = dma.done.wait [#allocation4], 128  }
 0x13a   :  { %441 = vsyncadd [#allocation4], 4294967168 }
 0x13b   :  { %249 = vsyncpa [#allocation3], 1 }
 0x13c   :  { %250 = vsyncpa [#allocation6], 1 }
 0x13d   :  { %251 = vsyncpa [#allocation4], 1 }

</bundles_post_ra>
